<compile_context>
chip_gen: v7x
topology: tpu7x:2x2x1
jax: 0.10.0
libtpu: 0.0.40
codegen_flags: <defaults>
</compile_context>

<pallas_src>
import functools

import numpy as np
import jax
import jax.numpy as jnp
from jax import lax
from jax.experimental import pallas as pl
from jax.experimental.pallas import tpu as pltpu


def _msblock_kernel(x_ref, w1_ref, b1_ref, w2_ref, b2_ref, coords_ref, o_ref,
                    *, k, m, H, W, nb, use_mxu):
    # x_ref     : (nb, Cin, H*W)   input images, spatial flattened onto lanes
    # w1_ref    : (m*Cin, Cin)     1x1 weight, row j*Cin+g  <->  mid ch g*m+j
    # b1_ref    : (m*Cin, 1)       1x1 bias, same row ordering (f32)
    # w2_ref    : (Cin, m*k*k)     grouped kxk weight, column j*k*k + ki*k + kj
    # b2_ref    : (Cin, 1)         grouped kxk bias (f32)
    # coords_ref: (2, H*W) int32   row 0 = h(lane), row 1 = w(lane)
    # o_ref     : (nb, Cin, H*W)   output images (f32)
    cin = o_ref.shape[1]
    HW = o_ref.shape[2]
    kk = k * k
    pad = k // 2

    # ---- hoisted, loop-invariant values (once per grid step) -------------
    w1 = w1_ref[...]                      # (m*Cin, Cin)
    b1 = b1_ref[...]                      # (m*Cin, 1) f32
    w2 = w2_ref[...]                      # (Cin, m*k*k) f32
    b2 = b2_ref[...]                      # (Cin, 1) f32
    hpos = coords_ref[0:1, :]             # (1, HW) int32
    wpos = coords_ref[1:2, :]             # (1, HW) int32

    # Per-tap static info: lane shift, f32 boundary mask, per-member w2 cols.
    taps = []
    for ki in range(k):
        for kj in range(k):
            dh, dw = ki - pad, kj - pad
            d = dh * W + dw
            conds = []
            if dh < 0:
                conds.append(hpos >= -dh)
            if dh > 0:
                conds.append(hpos < H - dh)
            if dw < 0:
                conds.append(wpos >= -dw)
            if dw > 0:
                conds.append(wpos < W - dw)
            mask = None
            if conds:
                valid = conds[0]
                for c in conds[1:]:
                    valid = jnp.logical_and(valid, c)
                mask = valid.astype(jnp.float32)            # (1, HW)
            t = ki * k + kj
            cols = [w2[:, j * kk + t:j * kk + t + 1] for j in range(m)]
            taps.append((d, mask, cols))

    def process_image(b):
        x = x_ref[b]                                        # (Cin, HW)

        # ---- fused 1x1 conv: all m members in one shot --------------------
        if use_mxu:
            # One (m*Cin, Cin) x (Cin, HW) matmul per image, f32 accumulate.
            y = jnp.dot(w1, x, preferred_element_type=jnp.float32)
        else:
            # Tiny channel counts: fused VPU broadcast-MACs, skip the MXU.
            y = w1[:, 0:1] * x[0:1, :]
            for i in range(1, cin):
                y = y + w1[:, i:i + 1] * x[i:i + 1, :]
        y = y + b1                                          # (m*Cin, HW) f32
        ymem = [y[j * cin:(j + 1) * cin, :] for j in range(m)]

        # ---- grouped kxk conv, tap-major: ONE roll + ONE mask per tap -----
        acc = jnp.zeros((cin, HW), jnp.float32)
        for d, mask, cols in taps:
            tmp = cols[0] * ymem[0]
            for j in range(1, m):
                tmp = tmp + cols[j] * ymem[j]
            if d != 0:
                tmp = pltpu.roll(tmp, shift=(-d) % HW, axis=1)
            if mask is not None:
                tmp = tmp * mask
            acc = acc + tmp
        o_ref[b] = (acc + b2).astype(o_ref.dtype)

    if nb == 1:
        process_image(0)
    else:
        def body(b, carry):
            process_image(b)
            return carry
        lax.fori_loop(0, nb, body, 0, unroll=True if nb <= 4 else False)


def msblock_1x1_kxk_pallas(x_nchw, w1, b1, w2, b2, kernel_size, *,
                           mxu_min_cin=16, mxu_dtype=jnp.float32):
    """x_nchw: (N, Cin, H, W).  Weights in PyTorch layout:
       w1: (Cmid, Cin, 1, 1), b1: (Cmid,), w2: (Cin, Cmid//Cin, k, k), b2: (Cin,)
    """
    N, Cin, H, W = x_nchw.shape
    Cmid = w1.shape[0]
    assert Cmid % Cin == 0, "grouped conv requires out_channel % in_channel == 0"
    m = Cmid // Cin
    k = int(kernel_size)
    pad = k // 2                                    # autopad(k)
    assert pad < H and pad < W, "roll+mask padding needs k//2 < min(H, W)"
    HW = H * W

    use_mxu = Cin >= mxu_min_cin
    in_dtype = mxu_dtype if use_mxu else jnp.float32

    # Free, contiguous reshape (no transpose): NCHW -> (N, Cin, H*W).
    x_flat = x_nchw.reshape(N, Cin, HW).astype(in_dtype)

    # Weight re-packing (tiny glue tensors):
    #   mid channel c = g*m + j  ->  stacked member-major row r = j*Cin + g.
    w1_mat = w1[:, :, 0, 0]                                            # (Cmid, Cin)
    w1s = jnp.transpose(w1_mat.reshape(Cin, m, Cin), (1, 0, 2))
    w1s = w1s.reshape(m * Cin, Cin).astype(in_dtype)                   # (m*Cin, Cin)
    b1s = jnp.transpose(b1.reshape(Cin, m), (1, 0)).reshape(m * Cin, 1)
    b1s = b1s.astype(jnp.float32)                                      # (m*Cin, 1)
    w2_k = w2.reshape(Cin, m * k * k).astype(jnp.float32)              # (Cin, m*k*k)
    b2_k = b2.reshape(Cin, 1).astype(jnp.float32)                      # (Cin, 1)

    # (h, w) lane-coordinate table for in-kernel boundary masks.
    lin = np.arange(HW, dtype=np.int32)
    coords = jnp.asarray(np.stack([lin // W, lin % W], axis=0))        # (2, HW) i32

    # ---- batch-block (nb) and VMEM sizing, generation-aware --------------
    x_bytes = Cin * HW * np.dtype(in_dtype).itemsize
    o_bytes = Cin * HW * 4
    blk_budget = 4 << 20                        # blocks get double-buffered (x2)
    nb = min(N,
             max(1, N // 2),                    # >=2 grid steps for v7x's 2 TCs
             max(1, blk_budget // max(1, x_bytes + o_bytes)))
    while N % nb:
        nb -= 1
    grid = (N // nb,)

    const_bytes = (w1s.size * np.dtype(in_dtype).itemsize
                   + 4 * (b1s.size + w2_k.size + b2_k.size + coords.size))
    temp_bytes = (m * Cin + 2 * Cin + k * k) * HW * 4     # y, tmp/acc, masks
    footprint = (2 * nb * (x_bytes + o_bytes) + 2 * const_bytes
                 + temp_bytes + (1 << 20))
    vmem_limit = int(min(48 << 20, max(footprint, 32 << 20)))

    kern = functools.partial(_msblock_kernel, k=k, m=m, H=H, W=W, nb=nb,
                             use_mxu=use_mxu)
    out_flat = pl.pallas_call(
        kern,
        out_shape=jax.ShapeDtypeStruct((N, Cin, HW), jnp.float32),
        grid_spec=pltpu.PrefetchScalarGridSpec(
            num_scalar_prefetch=0,
            grid=grid,
            in_specs=[
                pl.BlockSpec((nb, Cin, HW), lambda n: (n, 0, 0)),
                pl.BlockSpec((m * Cin, Cin), lambda n: (0, 0)),
                pl.BlockSpec((m * Cin, 1), lambda n: (0, 0)),
                pl.BlockSpec((Cin, m * k * k), lambda n: (0, 0)),
                pl.BlockSpec((Cin, 1), lambda n: (0, 0)),
                pl.BlockSpec((2, HW), lambda n: (0, 0)),
            ],
            out_specs=pl.BlockSpec((nb, Cin, HW), lambda n: (n, 0, 0)),
        ),
        compiler_params=pltpu.CompilerParams(
            dimension_semantics=("parallel",),
            vmem_limit_bytes=vmem_limit),
    )(x_flat, w1s, b1s, w2_k, b2_k, coords)

    return out_flat.reshape(N, Cin, H, W)        # free reshape back to NCHW


def _reference(x, w1, b1, w2, b2, k, in_c):
    """Plain-JAX reference mirroring the PyTorch module (NCHW, f32 HIGHEST)."""
    p = k // 2
    y = lax.conv_general_dilated(
        x, w1, (1, 1), 'VALID',
        dimension_numbers=('NCHW', 'OIHW', 'NCHW'),
        precision=lax.Precision.HIGHEST)
    y = y + b1[None, :, None, None]
    z = lax.conv_general_dilated(
        y, w2, (1, 1), [(p, p), (p, p)],
        feature_group_count=in_c,
        dimension_numbers=('NCHW', 'OIHW', 'NCHW'),
        precision=lax.Precision.HIGHEST)
    z = z + b2[None, :, None, None]
    return z


def _make_inputs(key, N, in_c, out_c, H, W, k):
    k0, k1, k2, k3, k4 = jax.random.split(key, 5)
    x = jax.random.normal(k0, (N, in_c, H, W), jnp.float32)
    w1 = jax.random.normal(k1, (out_c, in_c, 1, 1), jnp.float32) * 0.5
    b1 = jax.random.normal(k2, (out_c,), jnp.float32) * 0.1
    w2 = jax.random.normal(k3, (in_c, out_c // in_c, k, k), jnp.float32) * 0.5
    b2 = jax.random.normal(k4, (in_c,), jnp.float32) * 0.1
    return x, w1, b1, w2, b2


if __name__ == "__main__":
    key = jax.random.PRNGKey(0)
    key1, key2 = jax.random.split(key)

    # Main check: the module's toy config (N=2, Cin=4, 16x16, m=2, k=3).
    N, in_c, out_c, H, W, k = 2, 4, 8, 16, 16, 3
    x, w1, b1, w2, b2 = _make_inputs(key1, N, in_c, out_c, H, W, k)
    out = jax.block_until_ready(msblock_1x1_kxk_pallas(x, w1, b1, w2, b2, k))
    ref = _reference(x, w1, b1, w2, b2, k, in_c)
    assert out.shape == (N, in_c, H, W)
    err = float(jnp.max(jnp.abs(out - ref)))
    assert jnp.allclose(out, ref, atol=1e-3, rtol=1e-3), err

    # Secondary check: roll distance > 128 lanes (W=160) and a multi-image
    # grid block (N=4 -> nb=2), exercising the in-kernel image loop.
    N2, c2, oc2, H2, W2 = 4, 4, 8, 4, 160
    x2, w12, b12, w22, b22 = _make_inputs(key2, N2, c2, oc2, H2, W2, k)
    out2 = jax.block_until_ready(
        msblock_1x1_kxk_pallas(x2, w12, b12, w22, b22, k))
    ref2 = _reference(x2, w12, b12, w22, b22, k, c2)
    err2 = float(jnp.max(jnp.abs(out2 - ref2)))
    assert jnp.allclose(out2, ref2, atol=1e-3, rtol=1e-3), err2

    print("KERNEL_OK")
</pallas_src>

<mosaic_0001>
module attributes {stable_mosaic.version = 11 : i64} {
  func.func @_msblock_kernel(%arg0: i32, %arg1: memref<1x4x256xf32, #tpu.memory_space<vmem>>, %arg2: memref<8x4xf32, #tpu.memory_space<vmem>>, %arg3: memref<8x1xf32, #tpu.memory_space<vmem>>, %arg4: memref<4x18xf32, #tpu.memory_space<vmem>>, %arg5: memref<4x1xf32, #tpu.memory_space<vmem>>, %arg6: memref<2x256xi32, #tpu.memory_space<vmem>>, %arg7: memref<1x4x256xf32, #tpu.memory_space<vmem>>) attributes {dimension_semantics = [#tpu.dimension_semantics<parallel>], iteration_bounds = array<i64: 2>, scalar_prefetch = 0 : i64, scratch_operands = 0 : i64, tpu.core_type = #tpu.core_type<tc>, window_params = [{transform_indices = @transform_0, window_bounds = array<i64: 1, 4, 256>}, {pipeline_mode = #tpu.pipeline_mode<synchronous>, transform_indices = @transform_1, window_bounds = array<i64: 8, 4>}, {pipeline_mode = #tpu.pipeline_mode<synchronous>, transform_indices = @transform_2, window_bounds = array<i64: 8, 1>}, {pipeline_mode = #tpu.pipeline_mode<synchronous>, transform_indices = @transform_3, window_bounds = array<i64: 4, 18>}, {pipeline_mode = #tpu.pipeline_mode<synchronous>, transform_indices = @transform_4, window_bounds = array<i64: 4, 1>}, {pipeline_mode = #tpu.pipeline_mode<synchronous>, transform_indices = @transform_5, window_bounds = array<i64: 2, 256>}, {transform_indices = @transform_6, window_bounds = array<i64: 1, 4, 256>}]} {
    %c0 = arith.constant 0 : index
    %c0_0 = arith.constant 0 : index
    %0 = vector.load %arg2[%c0, %c0_0] : memref<8x4xf32, #tpu.memory_space<vmem>>, vector<8x4xf32>
    %c0_1 = arith.constant 0 : index
    %c0_2 = arith.constant 0 : index
    %1 = vector.load %arg3[%c0_1, %c0_2] : memref<8x1xf32, #tpu.memory_space<vmem>>, vector<8x1xf32>
    %c0_3 = arith.constant 0 : index
    %c0_4 = arith.constant 0 : index
    %2 = vector.load %arg4[%c0_3, %c0_4] : memref<4x18xf32, #tpu.memory_space<vmem>>, vector<4x18xf32>
    %c0_5 = arith.constant 0 : index
    %c0_6 = arith.constant 0 : index
    %3 = vector.load %arg5[%c0_5, %c0_6] : memref<4x1xf32, #tpu.memory_space<vmem>>, vector<4x1xf32>
    %c0_7 = arith.constant 0 : index
    %c0_8 = arith.constant 0 : index
    %4 = vector.load %arg6[%c0_7, %c0_8] : memref<2x256xi32, #tpu.memory_space<vmem>>, vector<1x256xi32>
    %c1 = arith.constant 1 : index
    %c0_9 = arith.constant 0 : index
    %5 = vector.load %arg6[%c1, %c0_9] : memref<2x256xi32, #tpu.memory_space<vmem>>, vector<1x256xi32>
    %c1_i32 = arith.constant 1 : i32
    %6 = vector.broadcast %c1_i32 : i32 to vector<1x256xi32>
    %7 = arith.cmpi sge, %4, %6 : vector<1x256xi32>
    %c1_i32_10 = arith.constant 1 : i32
    %8 = vector.broadcast %c1_i32_10 : i32 to vector<1x256xi32>
    %9 = arith.cmpi sge, %5, %8 : vector<1x256xi32>
    %10 = arith.andi %7, %9 : vector<1x256xi1>
    %11 = arith.extui %10 : vector<1x256xi1> to vector<1x256xi32>
    %12 = arith.sitofp %11 : vector<1x256xi32> to vector<1x256xf32>
    %13 = vector.extract_strided_slice %2 {offsets = [0, 0], sizes = [4, 1], strides = [1, 1]} : vector<4x18xf32> to vector<4x1xf32>
    %14 = vector.extract_strided_slice %2 {offsets = [0, 9], sizes = [4, 1], strides = [1, 1]} : vector<4x18xf32> to vector<4x1xf32>
    %c1_i32_11 = arith.constant 1 : i32
    %15 = vector.broadcast %c1_i32_11 : i32 to vector<1x256xi32>
    %16 = arith.cmpi sge, %4, %15 : vector<1x256xi32>
    %17 = arith.extui %16 : vector<1x256xi1> to vector<1x256xi32>
    %18 = arith.sitofp %17 : vector<1x256xi32> to vector<1x256xf32>
    %19 = vector.extract_strided_slice %2 {offsets = [0, 1], sizes = [4, 1], strides = [1, 1]} : vector<4x18xf32> to vector<4x1xf32>
    %20 = vector.extract_strided_slice %2 {offsets = [0, 10], sizes = [4, 1], strides = [1, 1]} : vector<4x18xf32> to vector<4x1xf32>
    %c1_i32_12 = arith.constant 1 : i32
    %21 = vector.broadcast %c1_i32_12 : i32 to vector<1x256xi32>
    %22 = arith.cmpi sge, %4, %21 : vector<1x256xi32>
    %c15_i32 = arith.constant 15 : i32
    %23 = vector.broadcast %c15_i32 : i32 to vector<1x256xi32>
    %24 = arith.cmpi slt, %5, %23 : vector<1x256xi32>
    %25 = arith.andi %22, %24 : vector<1x256xi1>
    %26 = arith.extui %25 : vector<1x256xi1> to vector<1x256xi32>
    %27 = arith.sitofp %26 : vector<1x256xi32> to vector<1x256xf32>
    %28 = vector.extract_strided_slice %2 {offsets = [0, 2], sizes = [4, 1], strides = [1, 1]} : vector<4x18xf32> to vector<4x1xf32>
    %29 = vector.extract_strided_slice %2 {offsets = [0, 11], sizes = [4, 1], strides = [1, 1]} : vector<4x18xf32> to vector<4x1xf32>
    %c1_i32_13 = arith.constant 1 : i32
    %30 = vector.broadcast %c1_i32_13 : i32 to vector<1x256xi32>
    %31 = arith.cmpi sge, %5, %30 : vector<1x256xi32>
    %32 = arith.extui %31 : vector<1x256xi1> to vector<1x256xi32>
    %33 = arith.sitofp %32 : vector<1x256xi32> to vector<1x256xf32>
    %34 = vector.extract_strided_slice %2 {offsets = [0, 3], sizes = [4, 1], strides = [1, 1]} : vector<4x18xf32> to vector<4x1xf32>
    %35 = vector.extract_strided_slice %2 {offsets = [0, 12], sizes = [4, 1], strides = [1, 1]} : vector<4x18xf32> to vector<4x1xf32>
    %36 = vector.extract_strided_slice %2 {offsets = [0, 4], sizes = [4, 1], strides = [1, 1]} : vector<4x18xf32> to vector<4x1xf32>
    %37 = vector.extract_strided_slice %2 {offsets = [0, 13], sizes = [4, 1], strides = [1, 1]} : vector<4x18xf32> to vector<4x1xf32>
    %c15_i32_14 = arith.constant 15 : i32
    %38 = vector.broadcast %c15_i32_14 : i32 to vector<1x256xi32>
    %39 = arith.cmpi slt, %5, %38 : vector<1x256xi32>
    %40 = arith.extui %39 : vector<1x256xi1> to vector<1x256xi32>
    %41 = arith.sitofp %40 : vector<1x256xi32> to vector<1x256xf32>
    %42 = vector.extract_strided_slice %2 {offsets = [0, 5], sizes = [4, 1], strides = [1, 1]} : vector<4x18xf32> to vector<4x1xf32>
    %43 = vector.extract_strided_slice %2 {offsets = [0, 14], sizes = [4, 1], strides = [1, 1]} : vector<4x18xf32> to vector<4x1xf32>
    %c15_i32_15 = arith.constant 15 : i32
    %44 = vector.broadcast %c15_i32_15 : i32 to vector<1x256xi32>
    %45 = arith.cmpi slt, %4, %44 : vector<1x256xi32>
    %c1_i32_16 = arith.constant 1 : i32
    %46 = vector.broadcast %c1_i32_16 : i32 to vector<1x256xi32>
    %47 = arith.cmpi sge, %5, %46 : vector<1x256xi32>
    %48 = arith.andi %45, %47 : vector<1x256xi1>
    %49 = arith.extui %48 : vector<1x256xi1> to vector<1x256xi32>
    %50 = arith.sitofp %49 : vector<1x256xi32> to vector<1x256xf32>
    %51 = vector.extract_strided_slice %2 {offsets = [0, 6], sizes = [4, 1], strides = [1, 1]} : vector<4x18xf32> to vector<4x1xf32>
    %52 = vector.extract_strided_slice %2 {offsets = [0, 15], sizes = [4, 1], strides = [1, 1]} : vector<4x18xf32> to vector<4x1xf32>
    %c15_i32_17 = arith.constant 15 : i32
    %53 = vector.broadcast %c15_i32_17 : i32 to vector<1x256xi32>
    %54 = arith.cmpi slt, %4, %53 : vector<1x256xi32>
    %55 = arith.extui %54 : vector<1x256xi1> to vector<1x256xi32>
    %56 = arith.sitofp %55 : vector<1x256xi32> to vector<1x256xf32>
    %57 = vector.extract_strided_slice %2 {offsets = [0, 7], sizes = [4, 1], strides = [1, 1]} : vector<4x18xf32> to vector<4x1xf32>
    %58 = vector.extract_strided_slice %2 {offsets = [0, 16], sizes = [4, 1], strides = [1, 1]} : vector<4x18xf32> to vector<4x1xf32>
    %c15_i32_18 = arith.constant 15 : i32
    %59 = vector.broadcast %c15_i32_18 : i32 to vector<1x256xi32>
    %60 = arith.cmpi slt, %4, %59 : vector<1x256xi32>
    %c15_i32_19 = arith.constant 15 : i32
    %61 = vector.broadcast %c15_i32_19 : i32 to vector<1x256xi32>
    %62 = arith.cmpi slt, %5, %61 : vector<1x256xi32>
    %63 = arith.andi %60, %62 : vector<1x256xi1>
    %64 = arith.extui %63 : vector<1x256xi1> to vector<1x256xi32>
    %65 = arith.sitofp %64 : vector<1x256xi32> to vector<1x256xf32>
    %66 = vector.extract_strided_slice %2 {offsets = [0, 8], sizes = [4, 1], strides = [1, 1]} : vector<4x18xf32> to vector<4x1xf32>
    %67 = vector.extract_strided_slice %2 {offsets = [0, 17], sizes = [4, 1], strides = [1, 1]} : vector<4x18xf32> to vector<4x1xf32>
    %c0_20 = arith.constant 0 : index
    %c0_21 = arith.constant 0 : index
    %c0_22 = arith.constant 0 : index
    %68 = vector.load %arg1[%c0_20, %c0_21, %c0_22] : memref<1x4x256xf32, #tpu.memory_space<vmem>>, vector<1x4x256xf32>
    %69 = vector.shape_cast %68 : vector<1x4x256xf32> to vector<4x256xf32>
    %70 = vector.extract_strided_slice %0 {offsets = [0, 0], sizes = [8, 1], strides = [1, 1]} : vector<8x4xf32> to vector<8x1xf32>
    %71 = vector.extract_strided_slice %69 {offsets = [0, 0], sizes = [1, 256], strides = [1, 1]} : vector<4x256xf32> to vector<1x256xf32>
    %72 = vector.broadcast %70 : vector<8x1xf32> to vector<8x256xf32>
    %73 = vector.broadcast %71 : vector<1x256xf32> to vector<8x256xf32>
    %74 = arith.mulf %72, %73 : vector<8x256xf32>
    %75 = vector.extract_strided_slice %0 {offsets = [0, 1], sizes = [8, 1], strides = [1, 1]} : vector<8x4xf32> to vector<8x1xf32>
    %76 = vector.extract_strided_slice %69 {offsets = [1, 0], sizes = [1, 256], strides = [1, 1]} : vector<4x256xf32> to vector<1x256xf32>
    %77 = vector.broadcast %75 : vector<8x1xf32> to vector<8x256xf32>
    %78 = vector.broadcast %76 : vector<1x256xf32> to vector<8x256xf32>
    %79 = arith.mulf %77, %78 : vector<8x256xf32>
    %80 = arith.addf %74, %79 : vector<8x256xf32>
    %81 = vector.extract_strided_slice %0 {offsets = [0, 2], sizes = [8, 1], strides = [1, 1]} : vector<8x4xf32> to vector<8x1xf32>
    %82 = vector.extract_strided_slice %69 {offsets = [2, 0], sizes = [1, 256], strides = [1, 1]} : vector<4x256xf32> to vector<1x256xf32>
    %83 = vector.broadcast %81 : vector<8x1xf32> to vector<8x256xf32>
    %84 = vector.broadcast %82 : vector<1x256xf32> to vector<8x256xf32>
    %85 = arith.mulf %83, %84 : vector<8x256xf32>
    %86 = arith.addf %80, %85 : vector<8x256xf32>
    %87 = vector.extract_strided_slice %0 {offsets = [0, 3], sizes = [8, 1], strides = [1, 1]} : vector<8x4xf32> to vector<8x1xf32>
    %88 = vector.extract_strided_slice %69 {offsets = [3, 0], sizes = [1, 256], strides = [1, 1]} : vector<4x256xf32> to vector<1x256xf32>
    %89 = vector.broadcast %87 : vector<8x1xf32> to vector<8x256xf32>
    %90 = vector.broadcast %88 : vector<1x256xf32> to vector<8x256xf32>
    %91 = arith.mulf %89, %90 : vector<8x256xf32>
    %92 = arith.addf %86, %91 : vector<8x256xf32>
    %93 = vector.broadcast %1 : vector<8x1xf32> to vector<8x256xf32>
    %94 = arith.addf %92, %93 : vector<8x256xf32>
    %95 = vector.extract_strided_slice %94 {offsets = [0, 0], sizes = [4, 256], strides = [1, 1]} : vector<8x256xf32> to vector<4x256xf32>
    %96 = vector.extract_strided_slice %94 {offsets = [4, 0], sizes = [4, 256], strides = [1, 1]} : vector<8x256xf32> to vector<4x256xf32>
    %cst = arith.constant 0.000000e+00 : f32
    %97 = vector.broadcast %cst : f32 to vector<4x256xf32>
    %98 = vector.broadcast %13 : vector<4x1xf32> to vector<4x256xf32>
    %99 = arith.mulf %98, %95 : vector<4x256xf32>
    %100 = vector.broadcast %14 : vector<4x1xf32> to vector<4x256xf32>
    %101 = arith.mulf %100, %96 : vector<4x256xf32>
    %102 = arith.addf %99, %101 : vector<4x256xf32>
    %c17_i32 = arith.constant 17 : i32
    %103 = tpu.dynamic_rotate %102 by %c17_i32 dim 1 : vector<4x256xf32>, i32 -> vector<4x256xf32>
    %104 = vector.broadcast %12 : vector<1x256xf32> to vector<4x256xf32>
    %105 = arith.mulf %103, %104 : vector<4x256xf32>
    %106 = arith.addf %97, %105 : vector<4x256xf32>
    %107 = vector.broadcast %19 : vector<4x1xf32> to vector<4x256xf32>
    %108 = arith.mulf %107, %95 : vector<4x256xf32>
    %109 = vector.broadcast %20 : vector<4x1xf32> to vector<4x256xf32>
    %110 = arith.mulf %109, %96 : vector<4x256xf32>
    %111 = arith.addf %108, %110 : vector<4x256xf32>
    %c16_i32 = arith.constant 16 : i32
    %112 = tpu.dynamic_rotate %111 by %c16_i32 dim 1 : vector<4x256xf32>, i32 -> vector<4x256xf32>
    %113 = vector.broadcast %18 : vector<1x256xf32> to vector<4x256xf32>
    %114 = arith.mulf %112, %113 : vector<4x256xf32>
    %115 = arith.addf %106, %114 : vector<4x256xf32>
    %116 = vector.broadcast %28 : vector<4x1xf32> to vector<4x256xf32>
    %117 = arith.mulf %116, %95 : vector<4x256xf32>
    %118 = vector.broadcast %29 : vector<4x1xf32> to vector<4x256xf32>
    %119 = arith.mulf %118, %96 : vector<4x256xf32>
    %120 = arith.addf %117, %119 : vector<4x256xf32>
    %c15_i32_23 = arith.constant 15 : i32
    %121 = tpu.dynamic_rotate %120 by %c15_i32_23 dim 1 : vector<4x256xf32>, i32 -> vector<4x256xf32>
    %122 = vector.broadcast %27 : vector<1x256xf32> to vector<4x256xf32>
    %123 = arith.mulf %121, %122 : vector<4x256xf32>
    %124 = arith.addf %115, %123 : vector<4x256xf32>
    %125 = vector.broadcast %34 : vector<4x1xf32> to vector<4x256xf32>
    %126 = arith.mulf %125, %95 : vector<4x256xf32>
    %127 = vector.broadcast %35 : vector<4x1xf32> to vector<4x256xf32>
    %128 = arith.mulf %127, %96 : vector<4x256xf32>
    %129 = arith.addf %126, %128 : vector<4x256xf32>
    %c1_i32_24 = arith.constant 1 : i32
    %130 = tpu.dynamic_rotate %129 by %c1_i32_24 dim 1 : vector<4x256xf32>, i32 -> vector<4x256xf32>
    %131 = vector.broadcast %33 : vector<1x256xf32> to vector<4x256xf32>
    %132 = arith.mulf %130, %131 : vector<4x256xf32>
    %133 = arith.addf %124, %132 : vector<4x256xf32>
    %134 = vector.broadcast %36 : vector<4x1xf32> to vector<4x256xf32>
    %135 = arith.mulf %134, %95 : vector<4x256xf32>
    %136 = vector.broadcast %37 : vector<4x1xf32> to vector<4x256xf32>
    %137 = arith.mulf %136, %96 : vector<4x256xf32>
    %138 = arith.addf %135, %137 : vector<4x256xf32>
    %139 = arith.addf %133, %138 : vector<4x256xf32>
    %140 = vector.broadcast %42 : vector<4x1xf32> to vector<4x256xf32>
    %141 = arith.mulf %140, %95 : vector<4x256xf32>
    %142 = vector.broadcast %43 : vector<4x1xf32> to vector<4x256xf32>
    %143 = arith.mulf %142, %96 : vector<4x256xf32>
    %144 = arith.addf %141, %143 : vector<4x256xf32>
    %c255_i32 = arith.constant 255 : i32
    %145 = tpu.dynamic_rotate %144 by %c255_i32 dim 1 : vector<4x256xf32>, i32 -> vector<4x256xf32>
    %146 = vector.broadcast %41 : vector<1x256xf32> to vector<4x256xf32>
    %147 = arith.mulf %145, %146 : vector<4x256xf32>
    %148 = arith.addf %139, %147 : vector<4x256xf32>
    %149 = vector.broadcast %51 : vector<4x1xf32> to vector<4x256xf32>
    %150 = arith.mulf %149, %95 : vector<4x256xf32>
    %151 = vector.broadcast %52 : vector<4x1xf32> to vector<4x256xf32>
    %152 = arith.mulf %151, %96 : vector<4x256xf32>
    %153 = arith.addf %150, %152 : vector<4x256xf32>
    %c241_i32 = arith.constant 241 : i32
    %154 = tpu.dynamic_rotate %153 by %c241_i32 dim 1 : vector<4x256xf32>, i32 -> vector<4x256xf32>
    %155 = vector.broadcast %50 : vector<1x256xf32> to vector<4x256xf32>
    %156 = arith.mulf %154, %155 : vector<4x256xf32>
    %157 = arith.addf %148, %156 : vector<4x256xf32>
    %158 = vector.broadcast %57 : vector<4x1xf32> to vector<4x256xf32>
    %159 = arith.mulf %158, %95 : vector<4x256xf32>
    %160 = vector.broadcast %58 : vector<4x1xf32> to vector<4x256xf32>
    %161 = arith.mulf %160, %96 : vector<4x256xf32>
    %162 = arith.addf %159, %161 : vector<4x256xf32>
    %c240_i32 = arith.constant 240 : i32
    %163 = tpu.dynamic_rotate %162 by %c240_i32 dim 1 : vector<4x256xf32>, i32 -> vector<4x256xf32>
    %164 = vector.broadcast %56 : vector<1x256xf32> to vector<4x256xf32>
    %165 = arith.mulf %163, %164 : vector<4x256xf32>
    %166 = arith.addf %157, %165 : vector<4x256xf32>
    %167 = vector.broadcast %66 : vector<4x1xf32> to vector<4x256xf32>
    %168 = arith.mulf %167, %95 : vector<4x256xf32>
    %169 = vector.broadcast %67 : vector<4x1xf32> to vector<4x256xf32>
    %170 = arith.mulf %169, %96 : vector<4x256xf32>
    %171 = arith.addf %168, %170 : vector<4x256xf32>
    %c239_i32 = arith.constant 239 : i32
    %172 = tpu.dynamic_rotate %171 by %c239_i32 dim 1 : vector<4x256xf32>, i32 -> vector<4x256xf32>
    %173 = vector.broadcast %65 : vector<1x256xf32> to vector<4x256xf32>
    %174 = arith.mulf %172, %173 : vector<4x256xf32>
    %175 = arith.addf %166, %174 : vector<4x256xf32>
    %176 = vector.broadcast %3 : vector<4x1xf32> to vector<4x256xf32>
    %177 = arith.addf %175, %176 : vector<4x256xf32>
    %c0_25 = arith.constant 0 : index
    %c0_26 = arith.constant 0 : index
    %c0_27 = arith.constant 0 : index
    %178 = vector.load %arg7[%c0_25, %c0_26, %c0_27] : memref<1x4x256xf32, #tpu.memory_space<vmem>>, vector<1x4x256xf32>
    %179 = vector.shape_cast %178 : vector<1x4x256xf32> to vector<4x256xf32>
    %180 = vector.shape_cast %177 : vector<4x256xf32> to vector<1x4x256xf32>
    tpu.vector_store %arg7[%c0_25, %c0_26, %c0_27], %180 {strides = array<i32>} : memref<1x4x256xf32, #tpu.memory_space<vmem>>, vector<1x4x256xf32>,
    return
  }
  func.func @transform_0(%arg0: i32) -> (i32, i32, i32) {
    %c0_i32 = arith.constant 0 : i32
    %c0_i32_0 = arith.constant 0 : i32
    %c0_i32_1 = arith.constant 0 : i32
    return %arg0, %c0_i32, %c0_i32_0 : i32, i32, i32
  }
  func.func @transform_1(%arg0: i32) -> (i32, i32) {
    %c0_i32 = arith.constant 0 : i32
    %c0_i32_0 = arith.constant 0 : i32
    %c0_i32_1 = arith.constant 0 : i32
    return %c0_i32, %c0_i32_0 : i32, i32
  }
  func.func @transform_2(%arg0: i32) -> (i32, i32) {
    %c0_i32 = arith.constant 0 : i32
    %c0_i32_0 = arith.constant 0 : i32
    %c0_i32_1 = arith.constant 0 : i32
    return %c0_i32, %c0_i32_0 : i32, i32
  }
  func.func @transform_3(%arg0: i32) -> (i32, i32) {
    %c0_i32 = arith.constant 0 : i32
    %c0_i32_0 = arith.constant 0 : i32
    %c0_i32_1 = arith.constant 0 : i32
    return %c0_i32, %c0_i32_0 : i32, i32
  }
  func.func @transform_4(%arg0: i32) -> (i32, i32) {
    %c0_i32 = arith.constant 0 : i32
    %c0_i32_0 = arith.constant 0 : i32
    %c0_i32_1 = arith.constant 0 : i32
    return %c0_i32, %c0_i32_0 : i32, i32
  }
  func.func @transform_5(%arg0: i32) -> (i32, i32) {
    %c0_i32 = arith.constant 0 : i32
    %c0_i32_0 = arith.constant 0 : i32
    %c0_i32_1 = arith.constant 0 : i32
    return %c0_i32, %c0_i32_0 : i32, i32
  }
  func.func @transform_6(%arg0: i32) -> (i32, i32, i32) {
    %c0_i32 = arith.constant 0 : i32
    %c0_i32_0 = arith.constant 0 : i32
    %c0_i32_1 = arith.constant 0 : i32
    return %arg0, %c0_i32, %c0_i32_0 : i32, i32, i32
  }
}

</mosaic_0001>

<bundles_post_ra>
// kernel: tpu_custom_call.1
= control target key start
LH: loop header
LB: loop body
LE: loop exit
PB: predicated region body
PF: predicated region fallthrough
CT: control target
= control target key end

     0   :  { %11 = vsyncpa [#allocation3], 0  ;;  %s1273_s0 = inlined_call_operand.vmem [shape: f32[2,4,256], index: 0, kind: input, shape index: {}]   ;;  %s1274_s1 = inlined_call_operand.vmem [shape: f32[8,4], index: 1, kind: input, shape index: {}]   ;;  %s1275_s2 = inlined_call_operand.vmem [shape: f32[8,1], index: 2, kind: input, shape index: {}]   ;;  %s1276_s3 = inlined_call_operand.vmem [shape: f32[4,18], index: 3, kind: input, shape index: {}]   ;;  %s1277_s4 = inlined_call_operand.vmem [shape: f32[4,1], index: 4, kind: input, shape index: {}]   ;;  %s1278_s5 = inlined_call_operand.vmem [shape: s32[2,256], index: 5, kind: input, shape index: {}]   ;;  %s1279_s6 = inlined_call_operand.hbm [shape: f32[2,4,256], index: 6, kind: output, shape index: {}]  }
   0x1   :  { %13 = vsyncpa [#allocation3 + $0x1], 0  ;;  %s1031_s21 = smov 0   ;;  %s1033_s22 = smov 0  }
   0x2   :  { %s1035_s23 = smov 0   ;;  %s1037_s24 = smov 0  }
   0x3 LB: > { %s1052_s25 = sadd.s32 4294967295, %s966_s24   ;;  %s792_s26 = sadd.s32 4294967294, %s966_s24   ;;  %s966_s24 = sphi %s1037_s24, %s1285_s24   ;;  %s962_s23 = sphi %s1035_s23, %s1284_s23   ;;  %s958_s22 = sphi %s1033_s22, %s1283_s22   ;;  %s954_s21 = sphi %s1031_s21, %s1282_s21  }
   0x4   : > { %s1056_s27 = sadd.s32 1, %s966_s24   ;;  %s157_s28 = sadd.s32 1, %s962_s23 }
   0x5   : > { %s154_s29 = ssub.s32 %s966_s24, %s1056_s27  ;;  %p167_p0 = scmp.ne.s32.totalorder %s962_s23, %s958_s22 }
   0x6   : > { %p155_p1 = scmp.eq.s32.totalorder %s154_s29, 0  ;;  %p168_p2 = scmp.eq.s32.totalorder %s1052_s25, 1 }
   0x7   : > { %p173_p3 = scmp.ne.s32.totalorder %s958_s22, %s954_s21  ;;  %p174_p4 = scmp.eq.s32.totalorder %s792_s26, 1 }
   0x8   : > { %s1067_s30 = scalar_select %p155_p1, %s962_s23, %s157_s28  }
   0x9   : > { %p1069_p5 = por %p168_p2, %p167_p0  ;;  %p1073_p6 = por %p174_p4, %p173_p3 }
   0xa   : > { %p795_p7 = scmp.ge.s32.totalorder %s966_s24, 1  ;;  %p215_p8 = scmp.lt.s32.totalorder %s966_s24, 3 }
   0xc   : > { %p216_p9 = pnand %p795_p7, %p215_p8 }
   0xd   : > { %v250_v0 = vld [vmem:[%s1274_s1] sm:$0xff] (!%p216_p9)  ;;  %v968_v1 = vmov (!%p216_p9), 2   ;;  %v969_v2 = vmov (!%p216_p9), 1   ;;  %v970_v3 = vmov (!%p216_p9), 3   ;;  %v971_v4 = vmov (!%p216_p9), 0   ;;  %p245_p10 = scmp.lt.s32.totalorder (!%p216_p9), %s1052_s25, 1 }
   0xe   : > { %219 = sbr.rel (%p216_p9) target bundleno = 352 (0x160), region = 44  ;;  %883 = vset.pattern.permute.xlu1 (!%p216_p9), %v968_v1  ;;  %881 = vset.pattern.permute.xlu0 (!%p216_p9), %v969_v2  ;;  %v252_v5 = vld [vmem:[%s1276_s3] sm:$0xf] (!%p216_p9)  ;;  %v972_v7 = vmov (!%p216_p9), 10   ;;  %v973_v8 = vmov (!%p216_p9), 9   ;;  %v974_v9 = vmov (!%p216_p9), 14   ;;  %v288_v21 = vlaneseq (!%p216_p9) }
   0xf   : > { %335 = vperm.xlu1 (!%p216_p9), %883, %v250_v0   ;;  %309 = vperm.xlu0 (!%p216_p9), %881, %v250_v0   ;;  %v251_v6 = vld [vmem:[%s1275_s2] sm:$0xff] (!%p216_p9)  ;;  %v975_v10 = vmov (!%p216_p9), 7   ;;  %v976_v11 = vmov (!%p216_p9), 11   ;;  %v977_v12 = vmov (!%p216_p9), 17   ;;  %v978_v13 = vmov (!%p216_p9), 12   ;;  %s986_s20 = smov (!%p216_p9), 17  }
  0x10   : > { %v979_v14 = vmov (!%p216_p9), 5   ;;  %v980_v15 = vmov (!%p216_p9), 6   ;;  %v981_v16 = vmov (!%p216_p9), 15   ;;  %v982_v17 = vmov (!%p216_p9), 16   ;;  %s987_s26 = smov (!%p216_p9), 16   ;;  %s988_s28 = smov (!%p216_p9), 15  }
  0x11   : > { %v983_v18 = vmov (!%p216_p9), 8   ;;  %v984_v19 = vmov (!%p216_p9), 4   ;;  %v985_v20 = vmov (!%p216_p9), 13   ;;  %v289_v22 = vshrl.u32 (!%p216_p9), %v288_v21, 7  ;;  %s989_s29 = smov (!%p216_p9), 1   ;;  %s990_s9 = smov (!%p216_p9), 127  }
  0x12   : > { %s991_s10 = smov (!%p216_p9), 113   ;;  %s992_s11 = smov (!%p216_p9), 112  }
  0x13   : > { %884 = vset.pattern.permute.xlu1 (!%p216_p9), %v970_v3  ;;  %882 = vset.pattern.permute.xlu0 (!%p216_p9), %v971_v4  ;;  %v1094_v23 = vsub.s32 (!%p216_p9), 1, %v289_v22  ;;  %v318_v24 = vsub.s32 (!%p216_p9), 5, %v289_v22  ;;  %v1096_v25 = vsub.s32 (!%p216_p9), 0, %v289_v22  ;;  %v294_v26 = vsub.s32 (!%p216_p9), 4, %v289_v22  ;;  %s993_s14 = smov (!%p216_p9), 111  }
  0x14   : > { %361 = vperm.xlu1 (!%p216_p9), %884, %v250_v0   ;;  %284 = vperm.xlu0 (!%p216_p9), %882, %v250_v0   ;;  %v340_v28 = vsub.s32 (!%p216_p9), 2, %v289_v22  ;;  %v344_v29 = vsub.s32 (!%p216_p9), 6, %v289_v22  ;;  %v366_v32 = vsub.s32 (!%p216_p9), 3, %v289_v22  ;;  %v370_v33 = vsub.s32 (!%p216_p9), 7, %v289_v22 }
  0x15   : > { %s246_s15 = scalar_select %p245_p10, %s1052_s25, 1 }
  0x17   : > { %s813_s16 = sshll.u32 %s246_s15, 3 }
  0x18   : > { %885 = vset.pattern.permute.xlu1 %v971_v4  ;;  %395 = vperm.xlu0 %882, %v252_v5   ;;  %s249_s19 = scalar_lea.vmem %s1273_s0, %s813_s16 }
  0x19   : > { %388 = vperm.xlu1 %885, %v251_v6   ;;  %v281_v27 = vld [vmem:[%s249_s19] sm:$0xff]  ;;  %s242_s19 = sand.u32 1, %s958_s22  }
  0x1a   : > { %v315_v30 = vrot.slane %v281_v27, %v1094_v23  ;;  %v319_v31 = vrot.slane %v281_v27, %v318_v24  ;;  %v291_v34 = vrot.slane %v281_v27, %v1096_v25  ;;  %v295_v35 = vrot.slane %v281_v27, %v294_v26  ;;  %s719_s12 = scalar_lea.sflag [#allocation3], %s242_s19 }
  0x1b   : > { %v341_v37 = vrot.slane %v281_v27, %v340_v28  ;;  %v345_v38 = vrot.slane %v281_v27, %v344_v29  ;;  %v367_v42 = vrot.slane %v281_v27, %v366_v32  ;;  %v371_v43 = vrot.slane %v281_v27, %v370_v33 }
  0x1c   : > { %888 = vset.pattern.permute.xlu0 %v972_v7  ;;  %v325_v40 = vrot.slane %v315_v30, %v1094_v23  ;;  %v329_v41 = vrot.slane %v319_v31, %v1094_v23  ;;  %v301_v44 = vrot.slane %v291_v34, %v1096_v25  ;;  %v305_v45 = vrot.slane %v295_v35, %v1096_v25 }
  0x1d   : > { %886 = vset.pattern.permute.xlu1 %v973_v8  ;;  %445 = vperm.xlu0 %888, %v252_v5   ;;  %v351_v46 = vrot.slane %v341_v37, %v340_v28  ;;  %v355_v47 = vrot.slane %v345_v38, %v340_v28  ;;  %v377_v52 = vrot.slane %v367_v42, %v366_v32 }
  0x1e   : > { %401 = vperm.xlu1 %886, %v252_v5   ;;  %v381_v53 = vrot.slane %v371_v43, %v366_v32 }
  0x21   : > { %891 = vset.pattern.permute.xlu0 %v970_v3 }
  0x22   : > { %887 = vset.pattern.permute.xlu1 %v969_v2  ;;  %511 = vperm.xlu0 %891, %v252_v5  }
  0x23   : > { %439 = vperm.xlu1 %887, %v252_v5  }
  0x26   : > { %894 = vset.pattern.permute.xlu0 %v974_v9 }
  0x27   : > { %889 = vset.pattern.permute.xlu1 %v968_v1  ;;  %569 = vperm.xlu0 %894, %v252_v5  }
  0x28   : > { %475 = vperm.xlu1 %889, %v252_v5  }
  0x2b   : > { %897 = vset.pattern.permute.xlu0 %v975_v10 }
  0x2c   : > { %890 = vset.pattern.permute.xlu1 %v976_v11  ;;  %635 = vperm.xlu0 %897, %v252_v5  }
  0x2d   : > { %481 = vperm.xlu1 %890, %v252_v5  }
  0x30   : > { %900 = vset.pattern.permute.xlu0 %v977_v12 }
  0x31   : > { %892 = vset.pattern.permute.xlu1 %v978_v13  ;;  %677 = vperm.xlu0 %900, %v252_v5  }
  0x32   : > { %517 = vperm.xlu1 %892, %v252_v5  }
  0x35   : > { %903 = vset.pattern.permute.xlu0 %v971_v4 }
  0x36   : > { %893 = vset.pattern.permute.xlu1 %v979_v14 }
  0x37   : > { %563 = vperm.xlu1 %893, %v252_v5  }
  0x3b   : > { %895 = vset.pattern.permute.xlu1 %v980_v15 }
  0x3c   : > { %599 = vperm.xlu1 %895, %v252_v5  }
  0x40   : > { %896 = vset.pattern.permute.xlu1 %v981_v16 }
  0x41   : > { %605 = vperm.xlu1 %896, %v252_v5  }
  0x45   : > { %898 = vset.pattern.permute.xlu1 %v982_v17 }
  0x46   : > { %641 = vperm.xlu1 %898, %v252_v5  }
  0x4a   : > { %899 = vset.pattern.permute.xlu1 %v983_v18 }
  0x4b   : > { %671 = vperm.xlu1 %899, %v252_v5  }
  0x4f   : > { %901 = vset.pattern.permute.xlu1 %v984_v19 }
  0x50   : > { %547 = vperm.xlu1 %901, %v252_v5  }
  0x54   : > { %902 = vset.pattern.permute.xlu1 %v985_v20 }
  0x55   : > { %553 = vperm.xlu1 %902, %v252_v5  }
  0x8e   : > { %v336_v36 = vpop.permute.xlu1 %335  ;;  %v310_v39 = vpop.permute.xlu0 %309 }
  0x8f   : > { %v330_v48 = vmul.f32 %v325_v40, %v310_v39  ;;  %v331_v49 = vmul.f32 %v329_v41, %v310_v39  ;;  %v356_v56 = vmul.f32 %v351_v46, %v336_v36  ;;  %v357_v57 = vmul.f32 %v355_v47, %v336_v36 }
  0x93   : > { %v362_v50 = vpop.permute.xlu1 %361  ;;  %v285_v51 = vpop.permute.xlu0 %284 }
  0x94   : > { %v306_v54 = vmul.f32 %v301_v44, %v285_v51  ;;  %v307_v55 = vmul.f32 %v305_v45, %v285_v51  ;;  %v382_v60 = vmul.f32 %v377_v52, %v362_v50  ;;  %v383_v61 = vmul.f32 %v381_v53, %v362_v50 }
  0x96   : > { %v332_v58 = vadd.f32 %v330_v48, %v306_v54  ;;  %v333_v59 = vadd.f32 %v331_v49, %v307_v55 }
  0x97   : > { %v396_v5 = vpop.permute.xlu0 %395 }
  0x98   : > { %v389_v62 = vpop.permute.xlu1 %388  ;;  %v358_v63 = vadd.f32 %v356_v56, %v332_v58  ;;  %v359_v0 = vadd.f32 %v357_v57, %v333_v59 }
  0x9a   : > { %v384_v1 = vadd.f32 %v382_v60, %v358_v63  ;;  %v385_v2 = vadd.f32 %v383_v61, %v359_v0 }
  0x9c   : > { %v1104_v3 = vadd.f32 %v389_v62, %v384_v1  ;;  %v1106_v4 = vadd.f32 %v389_v62, %v385_v2  ;;  %v446_v15 = vpop.permute.xlu0 %445 }
  0x9d   : > { %v402_v6 = vpop.permute.xlu1 %401 }
  0x9e   : > { %v1109_v7 = vrot.slane %v1104_v3, 4  ;;  %v1112_v8 = vrot.slane %v1106_v4, 4  ;;  %v398_v9 = vmul.f32 %v396_v5, %v1104_v3  ;;  %v399_v10 = vmul.f32 %v396_v5, %v1106_v4 }
  0xa0   : > { %v410_v11 = vmul.f32 %v1109_v7, %v402_v6  ;;  %v411_v12 = vmul.f32 %v1112_v8, %v402_v6  ;;  %v448_v17 = vmul.f32 %v446_v15, %v1109_v7  ;;  %v449_v18 = vmul.f32 %v446_v15, %v1112_v8 }
  0xa1   : > { %v512_v32 = vpop.permute.xlu0 %511 }
  0xa2   : > { %v412_v13 = vadd.f32 %v410_v11, %v398_v9  ;;  %v413_v14 = vadd.f32 %v411_v12, %v399_v10  ;;  %v440_v16 = vpop.permute.xlu1 %439  ;;  %v514_v36 = vmul.f32 %v512_v32, %v1104_v3  ;;  %v515_v37 = vmul.f32 %v512_v32, %v1106_v4  ;;  %v253_v10 = vld [vmem:[%s1277_s4] sm:$0xf] }
  0xa3   : > { %v442_v19 = vmul.f32 %v440_v16, %v1104_v3  ;;  %v443_v20 = vmul.f32 %v440_v16, %v1106_v4 }
  0xa4   : > { %416 = vrot.lane.b32.xlu1 %v413_v14, %s986_s20  ;;  %414 = vrot.lane.b32.xlu0 %v412_v13, %s986_s20  ;;  %s796_s20 = sshll.u32 %s242_s19, 3 }
  0xa5   : > { %v450_v22 = vadd.f32 %v448_v17, %v442_v19  ;;  %v451_v24 = vadd.f32 %v449_v18, %v443_v20 }
  0xa6   : > { %v570_v40 = vpop.permute.xlu0 %569 }
  0xa7   : > { %v476_v26 = vpop.permute.xlu1 %475  ;;  %v572_v44 = vmul.f32 %v570_v40, %v1109_v7  ;;  %v573_v45 = vmul.f32 %v570_v40, %v1112_v8 }
  0xa8   : > { %454 = vrot.lane.b32.xlu1 %v451_v24, %s987_s26  ;;  %452 = vrot.lane.b32.xlu0 %v450_v22, %s987_s26  ;;  %v478_v28 = vmul.f32 %v476_v26, %v1104_v3  ;;  %v479_v29 = vmul.f32 %v476_v26, %v1106_v4  ;;  %s814_s26 = sshll.u32 %s1052_s25, 7  ;;  %s995_s25 = smov [#allocation2]  }
  0xab   : > { %v636_v56 = vpop.permute.xlu0 %635 }
  0xac   : > { %v482_v27 = vpop.permute.xlu1 %481  ;;  %v638_v60 = vmul.f32 %v636_v56, %v1104_v3  ;;  %v639_v61 = vmul.f32 %v636_v56, %v1106_v4 }
  0xad   : > { %v484_v30 = vmul.f32 %v482_v27, %v1109_v7  ;;  %v485_v31 = vmul.f32 %v482_v27, %v1112_v8 }
  0xaf   : > { %v486_v33 = vadd.f32 %v484_v30, %v478_v28  ;;  %v487_v34 = vadd.f32 %v485_v31, %v479_v29  ;;  %v1160_v29 = vld [vmem:[%s1278_s5] ss:$2 sm:$0x3]  ;;  %v1173_v30 = vand.u32 127, %v288_v21  ;;  %v994_v31 = vmov 0.0  }
  0xb0   : > { %v678_v0 = vpop.permute.xlu0 %677  ;;  %vm257_vm0 = vcmp.ge.s32.totalorder %v1160_v29, 1  ;;  %vm272_vm9 = vcmp.lt.s32.totalorder %v1160_v29, 15 }
  0xb1   : > { %v518_v35 = vpop.permute.xlu1 %517  ;;  %490 = vrot.lane.b32.xlu1 %v487_v34, %s988_s28  ;;  %488 = vrot.lane.b32.xlu0 %v486_v33, %s988_s28  ;;  %v680_v6 = vmul.f32 %v678_v0, %v1109_v7  ;;  %v681_v13 = vmul.f32 %v678_v0, %v1112_v8  ;;  %v801_v32 = vsel %vm257_vm0, 1.0, %v994_v31  ;;  %vm456_vm5 = vcmp.lt.s32.totalorder %v1173_v30, 16  ;;  %s244_s28 = scalar_lea.vmem [#allocation2], %s796_s20 }
  0xb2   : > { %v520_v38 = vmul.f32 %v518_v35, %v1109_v7  ;;  %v521_v39 = vmul.f32 %v518_v35, %v1112_v8  ;;  %vm420_vm6 = vcmp.lt.s32.totalorder %v1173_v30, 17  ;;  %v467_v21 = vrot.slane %v801_v32, %v1094_v23 }
  0xb3   : > { %vm492_vm7 = vcmp.lt.s32.totalorder %v1173_v30, 15  ;;  %vm528_vm8 = vcmp.lt.s32.totalorder %v1173_v30, 1  ;;  %vm580_vm11 = vcmp.lt.s32.totalorder %v1173_v30, 127  ;;  %vm616_vm13 = vcmp.lt.s32.totalorder %v1173_v30, 113 }
  0xb4   : > { %v522_v41 = vadd.f32 %v520_v38, %v514_v36  ;;  %v523_v42 = vadd.f32 %v521_v39, %v515_v37  ;;  %v463_v36 = vrot.slane %v801_v32, %v1096_v25  ;;  %vm652_vm14 = vcmp.lt.s32.totalorder %v1173_v30, 112 }
  0xb5   : > { %vm688_vm15 = vcmp.lt.s32.totalorder %v1173_v30, 111 }
  0xb6   : > { %v564_v43 = vpop.permute.xlu1 %563  ;;  %526 = vrot.lane.b32.xlu1 %v523_v42, %s989_s29  ;;  %524 = vrot.lane.b32.xlu0 %v522_v41, %s989_s29  ;;  %s733_s29 = sshll.u32 %s244_s28, 4  ;;  %s1233_s29 = int_to_ptr.vmem [resolvable:$true] %s733_s29 }
  0xb7   : > { %v566_v46 = vmul.f32 %v564_v43, %v1104_v3  ;;  %v567_v47 = vmul.f32 %v564_v43, %v1106_v4  ;;  %s904_s13 = scalar_lea.vmem %s1233_s29, 128 }
  0xb8   : > { %p905_p11 = scmp.ne.s32.totalorder %s1233_s29, %s904_s13 }
  0xb9   : > { %v574_v48 = vadd.f32 %v572_v44, %v566_v46  ;;  %v575_v49 = vadd.f32 %v573_v45, %v567_v47 }
  0xba   : > { %p906_p12 = pnand %p905_p11, %p1069_p5 }
  0xbb   : > { %v600_v50 = vpop.permute.xlu1 %599  ;;  %578 = vrot.lane.b32.xlu1 %v575_v49, %s990_s9  ;;  %576 = vrot.lane.b32.xlu0 %v574_v48, %s990_s9 }
  0xbc   : > { %v602_v52 = vmul.f32 %v600_v50, %v1104_v3  ;;  %v603_v53 = vmul.f32 %v600_v50, %v1106_v4  ;;  %p907_p13 = pneg %p906_p12 }
  0xc0   : > { %v606_v51 = vpop.permute.xlu1 %605 }
  0xc1   : > { %v608_v54 = vmul.f32 %v606_v51, %v1109_v7  ;;  %v609_v55 = vmul.f32 %v606_v51, %v1112_v8 }
  0xc3   : > { %v610_v57 = vadd.f32 %v608_v54, %v602_v52  ;;  %v611_v58 = vadd.f32 %v609_v55, %v603_v53 }
  0xc5   : > { %v642_v59 = vpop.permute.xlu1 %641  ;;  %614 = vrot.lane.b32.xlu1 %v611_v58, %s991_s10  ;;  %612 = vrot.lane.b32.xlu0 %v610_v57, %s991_s10 }
  0xc6   : > { %v644_v62 = vmul.f32 %v642_v59, %v1109_v7  ;;  %v645_v63 = vmul.f32 %v642_v59, %v1112_v8 }
  0xc8   : > { %v646_v1 = vadd.f32 %v644_v62, %v638_v60  ;;  %v647_v2 = vadd.f32 %v645_v63, %v639_v61 }
  0xca   : > { %v672_v5 = vpop.permute.xlu1 %671  ;;  %650 = vrot.lane.b32.xlu1 %v647_v2, %s992_s11  ;;  %648 = vrot.lane.b32.xlu0 %v646_v1, %s992_s11  ;;  %s1231_s11 = scalar_lea.hbm %s1279_s6, %s814_s26 }
  0xcb   : > { %v674_v9 = vmul.f32 %v672_v5, %v1104_v3  ;;  %v675_v11 = vmul.f32 %v672_v5, %v1106_v4 }
  0xcd   : > { %v682_v12 = vadd.f32 %v680_v6, %v674_v9  ;;  %v683_v15 = vadd.f32 %v681_v13, %v675_v11 }
  0xce   : > { %708 = vperm.xlu0 %903, %v253_v10  }
  0xcf   : > { %v548_v14 = vpop.permute.xlu1 %547  ;;  %684 = vrot.lane.b32.xlu1 %v682_v12, %s993_s14 }
  0xd0   : > { %v550_v17 = vmul.f32 %v548_v14, %v1104_v3  ;;  %v551_v18 = vmul.f32 %v548_v14, %v1106_v4  ;;  %v1165_v3 = vld [vmem:[%s1278_s5 + $0x1] ss:$2 sm:$0x3] }
  0xd1   : > { %vm258_vm1 = vcmp.ge.s32.totalorder %v1165_v3, 1  ;;  %vm264_vm2 = vcmp.lt.s32.totalorder %v1165_v3, 15 }
  0xd2   : > { %vm259_vm3 = vmand %vm257_vm0, %vm258_vm1  ;;  %v803_v41 = vsel %vm258_vm1, 1.0, %v994_v31  ;;  %v804_v6 = vsel %vm264_vm2, 1.0, %v994_v31 }
  0xd3   : > { %686 = vrot.lane.b32.xlu1 %v683_v15, %s993_s14  ;;  %vm265_vm4 = vmand %vm257_vm0, %vm264_vm2  ;;  %v800_v34 = vsel %vm259_vm3, 1.0, %v994_v31  ;;  %v535_v52 = vrot.slane %v803_v41, %v1096_v25  ;;  %v539_v53 = vrot.slane %v803_v41, %v1094_v23  ;;  %v587_v14 = vrot.slane %v804_v6, %v1096_v25  ;;  %s908_s14 = sshll.u32 %s995_s25, 4  ;;  %s909_s14 = int_to_ptr.vmem [resolvable:$false] %s908_s14 }
  0xd4   : > { %v554_v16 = vpop.permute.xlu1 %553  ;;  %v802_v35 = vsel %vm265_vm4, 1.0, %v994_v31  ;;  %v427_v38 = vrot.slane %v800_v34, %v1096_v25  ;;  %v431_v42 = vrot.slane %v800_v34, %v1094_v23  ;;  %vm273_vm10 = vmand %vm272_vm9, %vm258_vm1  ;;  %v591_v15 = vrot.slane %v804_v6, %v1094_v23  ;;  %s910_s15 = scalar_lea.vmem %s909_s14, 256  ;;  %p911_p0 = scmp.lt.s32.totalorder %s1233_s29, %s909_s14 }
  0xd5   : > { %v556_v19 = vmul.f32 %v554_v16, %v1109_v7  ;;  %v557_v20 = vmul.f32 %v554_v16, %v1112_v8  ;;  %v499_v43 = vrot.slane %v802_v35, %v1096_v25  ;;  %v503_v44 = vrot.slane %v802_v35, %v1094_v23  ;;  %vm278_vm12 = vmand %vm272_vm9, %vm264_vm2  ;;  %p912_p1 = scmp.lt.s32.totalorder %s910_s15, %s904_s13 }
  0xd6   : > { %v805_v12 = vsel %vm273_vm10, 1.0, %v994_v31  ;;  %v807_v3 = vsel %vm278_vm12, 1.0, %v994_v31 }
  0xd7   : > { %v1153_v22 = vadd.f32 %v556_v19, %v550_v17  ;;  %v1155_v24 = vadd.f32 %v557_v20, %v551_v18  ;;  %v623_v18 = vrot.slane %v805_v12, %v1096_v25  ;;  %v627_v19 = vrot.slane %v805_v12, %v1094_v23  ;;  %p913_p2 = por %p912_p1, %p911_p0 }
  0xd8   : > { %v806_v20 = vsel %vm272_vm9, 1.0, %v994_v31 }
  0xd9   : > { %v659_v34 = vrot.slane %v806_v20, %v1096_v25  ;;  %v663_v29 = vrot.slane %v806_v20, %v1094_v23  ;;  %p914_p3 = pnand %p913_p2, %p907_p13 }
 0x116   : > { %v417_v26 = vpop.permute.xlu1 %416  ;;  %v415_v27 = vpop.permute.xlu0 %414 }
 0x117   : > { %v421_v45 = vsel %vm420_vm6, %v415_v27, %v417_v26  ;;  %v422_v46 = vsel %vm420_vm6, %v417_v26, %v415_v27 }
 0x118   : > { %v434_v56 = vmul.f32 %v427_v38, %v422_v46  ;;  %v435_v57 = vmul.f32 %v431_v42, %v421_v45 }
 0x11a   : > { %v455_v28 = vpop.permute.xlu1 %454  ;;  %v453_v4 = vpop.permute.xlu0 %452 }
 0x11b   : > { %v457_v39 = vsel %vm456_vm5, %v453_v4, %v455_v28  ;;  %v458_v40 = vsel %vm456_vm5, %v455_v28, %v453_v4 }
 0x11c   : > { %v470_v50 = vmul.f32 %v463_v36, %v458_v40  ;;  %v471_v51 = vmul.f32 %v467_v21, %v457_v39  ;;  %v695_v21 = vrot.slane %v807_v3, %v1096_v25 }
 0x11e   : > { %v472_v62 = vadd.f32 %v470_v50, %v434_v56  ;;  %v473_v63 = vadd.f32 %v471_v51, %v435_v57 }
 0x123   : > { %v491_v7 = vpop.permute.xlu1 %490  ;;  %v489_v8 = vpop.permute.xlu0 %488 }
 0x124   : > { %v493_v47 = vsel %vm492_vm7, %v489_v8, %v491_v7  ;;  %v494_v48 = vsel %vm492_vm7, %v491_v7, %v489_v8 }
 0x125   : > { %v506_v58 = vmul.f32 %v499_v43, %v494_v48  ;;  %v507_v59 = vmul.f32 %v503_v44, %v493_v47 }
 0x127   : > { %v508_v2 = vadd.f32 %v506_v58, %v472_v62  ;;  %v509_v5 = vadd.f32 %v507_v59, %v473_v63 }
 0x128   : > { %v527_v33 = vpop.permute.xlu1 %526  ;;  %v525_v37 = vpop.permute.xlu0 %524 }
 0x129   : > { %v529_v54 = vsel %vm528_vm8, %v525_v37, %v527_v33  ;;  %v530_v55 = vsel %vm528_vm8, %v527_v33, %v525_v37  ;;  %v699_v37 = vrot.slane %v807_v3, %v1094_v23 }
 0x12a   : > { %v542_v0 = vmul.f32 %v535_v52, %v530_v55  ;;  %v543_v1 = vmul.f32 %v539_v53, %v529_v54 }
 0x12c   : > { %v544_v10 = vadd.f32 %v542_v0, %v508_v2  ;;  %v545_v11 = vadd.f32 %v543_v1, %v509_v5 }
 0x12d   : > { %v579_v49 = vpop.permute.xlu1 %578  ;;  %v577_v60 = vpop.permute.xlu0 %576 }
 0x12e   : > { %v581_v16 = vsel %vm580_vm11, %v577_v60, %v579_v49  ;;  %v582_v17 = vsel %vm580_vm11, %v579_v49, %v577_v60  ;;  %v560_v26 = vadd.f32 %v1153_v22, %v544_v10  ;;  %v561_v27 = vadd.f32 %v1155_v24, %v545_v11 }
 0x12f   : > { %v594_v4 = vmul.f32 %v587_v14, %v581_v16  ;;  %v595_v7 = vmul.f32 %v591_v15, %v582_v17 }
 0x131   : > { %v596_v31 = vadd.f32 %v594_v4, %v560_v26  ;;  %v597_v38 = vadd.f32 %v595_v7, %v561_v27 }
 0x137   : > { %v615_v61 = vpop.permute.xlu1 %614  ;;  %v613_v9 = vpop.permute.xlu0 %612 }
 0x138   : > { %v617_v8 = vsel %vm616_vm13, %v613_v9, %v615_v61  ;;  %v618_v32 = vsel %vm616_vm13, %v615_v61, %v613_v9 }
 0x139   : > { %v630_v22 = vmul.f32 %v623_v18, %v617_v8  ;;  %v631_v24 = vmul.f32 %v627_v19, %v618_v32 }
 0x13b   : > { %v632_v44 = vadd.f32 %v630_v22, %v596_v31  ;;  %v633_v45 = vadd.f32 %v631_v24, %v597_v38 }
 0x13c   : > { %v651_v13 = vpop.permute.xlu1 %650  ;;  %v649_v28 = vpop.permute.xlu0 %648 }
 0x13d   : > { %v653_v35 = vsel %vm652_vm14, %v649_v28, %v651_v13  ;;  %v654_v36 = vsel %vm652_vm14, %v651_v13, %v649_v28 }
 0x13e   : > { %v666_v40 = vmul.f32 %v659_v34, %v653_v35  ;;  %v667_v41 = vmul.f32 %v663_v29, %v654_v36 }
 0x140   : > { %v668_v47 = vadd.f32 %v666_v40, %v632_v44  ;;  %v669_v48 = vadd.f32 %v667_v41, %v633_v45 }
 0x141   : > { %v685_v33 = vpop.permute.xlu1 %684 }
 0x145   : > { %v687_v39 = vpop.permute.xlu1 %686 }
 0x146   : > { %v689_v42 = vsel %vm688_vm15, %v685_v33, %v687_v39  ;;  %v690_v43 = vsel %vm688_vm15, %v687_v39, %v685_v33 }
 0x147   : > { %v702_v46 = vmul.f32 %v695_v21, %v689_v42  ;;  %v703_v30 = vmul.f32 %v699_v37, %v690_v43 }
 0x149   : > { %v704_v25 = vadd.f32 %v702_v46, %v668_v47  ;;  %v705_v49 = vadd.f32 %v703_v30, %v669_v48 }
 0x14d   : > { %v709_v23 = vpop.permute.xlu0 %708 }
 0x14e   : > { %v711_v50 = vadd.f32 %v709_v23, %v704_v25  ;;  %v712_v51 = vadd.f32 %v709_v23, %v705_v49 }
 0x150   : > { %v715_v52 = vcombine.low %v711_v50, %v712_v51 }
 0x152   : > { %717 = vst [vmem:[%s244_s28] sm:$0xff] %v715_v52 }
 0x153   : > { %917 = shalt.err (!%p914_p3)
}
 0x154   : > { %s918_s16 = scalar_lea.hbm %s1231_s11, 128  ;;  %s922_s19 = scalar_lea.hbm %s1279_s6, 256 }
 0x155   : > { %p919_p4 = scmp.ne.s32.totalorder %s1231_s11, %s918_s16  ;;  %p923_p9 = scmp.lt.u32.totalorder %s1231_s11, %s1279_s6 }
 0x156   : > { %p924_p10 = scmp.lt.u32.totalorder %s922_s19, %s918_s16  ;;  %p926_p12 = scmp.lt.u32.totalorder %s918_s16, %s1231_s11 }
 0x157   : > { %p920_p7 = pnand %p919_p4, %p1069_p5 }
 0x158   : > { %p925_p11 = por %p924_p10, %p923_p9 }
 0x159   : > { %p921_p8 = pneg %p920_p7 }
 0x15a   : > { %p927_p13 = por %p926_p12, %p925_p11 }
 0x15c   : > { %p928_p0 = pnand %p927_p13, %p921_p8 }
 0x15e   : > { %931 = shalt.err (!%p928_p0)
}
 0x15f   : > { %815 = dma.vmem_to_hbm [thread:$0]  (%p1069_p5), %s1233_s29, 128, %s1231_s11, %s719_s12  }
 0x160 PF: > { %p821_p1 = scmp.ge.s32.totalorder %s966_s24, 2  ;;  %s745_s28 = sand.u32 1, %s954_s21  }
 0x161   : > { %s746_s9 = scalar_lea.sflag [#allocation3], %s745_s28 }
 0x162   : > { %p818_p2 = pnand %p821_p1, %p1073_p6 }
 0x164   : > { %949 = dma.done.wait (!%p818_p2), %s746_s9, 128  }
 0x165   : > { %951 = vsyncadd (!%p818_p2), %s746_s9, 4294967168  ;;  %p16_p3 = scmp.ge.s32.totalorder %s1056_s27, 4   ;;  %s1282_s21 = smov %s958_s22 }
 0x166   : > { %s1283_s22 = smov %s962_s23  ;;  %s1284_s23 = smov %s1067_s30 }
 0x167   : > { %s1285_s24 = smov %s1056_s27  ;;  %18 = sbr.rel (!%p16_p3) target bundleno = 3 (0x3), region = 80 }
 0x16e   :  { %751 = vsyncpa [#allocation3], 1 }
 0x16f   :  { %753 = vsyncpa [#allocation3 + $0x1], 1 }

</bundles_post_ra>
